<compile_context>
chip_gen: v7x
topology: tpu7x:2x2x1
jax: 0.10.0
libtpu: 0.0.40
codegen_flags: <defaults>
</compile_context>

<pallas_src>
import functools
import math

import jax
import jax.numpy as jnp
from jax.experimental import pallas as pl
from jax.experimental.pallas import tpu as pltpu

_LANES = 128
_SUBLANES = 8


def _cdiv(a, b):
    return -(-a // b)


def _round_up(a, b):
    return _cdiv(a, b) * b


def _sumsq_kernel(pred_ref, target_ref, out_ref, *,
                  rows, blocks_per_p, block_rows, need_mask):
    p = pl.program_id(0)
    r = pl.program_id(1)

    # Reset this core's (1, 8, 128) partial accumulator at the start of its
    # serial ("arbitrary") reduction slice; the output block stays resident in
    # VMEM across the whole r axis (same block index every step).
    @pl.when(r == 0)
    def _():
        out_ref[...] = jnp.zeros_like(out_ref)

    d = target_ref[...].astype(jnp.float32) - pred_ref[...].astype(jnp.float32)
    sq = d * d                                               # (block_rows, 128)
    sq3 = sq.reshape(block_rows // _SUBLANES, _SUBLANES, _LANES)

    if need_mask:
        base = (p * blocks_per_p + r) * block_rows
        interior = base + block_rows <= rows                 # fully in range?

        @pl.when(interior)
        def _():
            out_ref[...] += jnp.sum(sq3, axis=0, keepdims=True)

        @pl.when(jnp.logical_not(interior))
        def _():
            # Boundary (ragged last block) or clamped duplicate block from the
            # parallel split: zero every out-of-range row before reducing.
            row_ids = jax.lax.broadcasted_iota(jnp.int32, sq.shape, 0)
            masked = jnp.where(base + row_ids < rows, sq, 0.0)
            m3 = masked.reshape(block_rows // _SUBLANES, _SUBLANES, _LANES)
            out_ref[...] += jnp.sum(m3, axis=0, keepdims=True)
    else:
        out_ref[...] += jnp.sum(sq3, axis=0, keepdims=True)


def _chip_kind():
    try:
        return jax.devices()[0].device_kind.lower()
    except Exception:
        return ""


def compute_error(pred, target, *, max_block_rows=None, parallel_splits=None):
    """sqrt(mean((target - pred)**2)); sum of squares via a Pallas TPU kernel."""
    assert pred.shape == target.shape
    assert pred.dtype == target.dtype
    n = int(math.prod(pred.shape)) if pred.ndim else 1
    assert n > 0

    pred_flat = pred.reshape(-1)
    target_flat = target.reshape(-1)

    rows = n // _LANES                  # full 128-lane rows for the kernel
    rem = n - rows * _LANES             # < 128 trailing elements (ragged only)

    # Ragged tail handled with a tiny plain-JAX sum: no whole-tensor pad copy.
    if rem:
        t_tail = target_flat[rows * _LANES:].astype(jnp.float32)
        p_tail = pred_flat[rows * _LANES:].astype(jnp.float32)
        tail_sumsq = jnp.sum((t_tail - p_tail) ** 2)
    else:
        tail_sumsq = jnp.float32(0.0)

    if rows == 0:
        # Fewer than 128 elements: a kernel launch isn't worth it.
        return jnp.sqrt(tail_sumsq / jnp.float32(n))

    if rem:
        # Only host-side data movement on ragged sizes (prefix slice feeding
        # the kernel); divisible sizes are copy-free.
        pred_flat = jax.lax.slice(pred_flat, (0,), (rows * _LANES,))
        target_flat = jax.lax.slice(target_flat, (0,), (rows * _LANES,))

    pred2d = pred_flat.reshape(rows, _LANES)
    target2d = target_flat.reshape(rows, _LANES)

    kind = _chip_kind()
    if max_block_rows is None:
        # v7x-class HBM (~3.2 TB/s/TC) hides the ~0.35us/step overhead only
        # with bigger tiles; 2048 rows (~1 MiB f32/input/step) elsewhere.
        max_block_rows = 4096 if "7" in kind else 2048
    if parallel_splits is None:
        # Split the leading "parallel" axis only on multi-TensorCore chips.
        parallel_splits = 2 if any(t in kind for t in ("v4", "v5p", "7")) else 1

    # Sub-32-bit dtypes pack more rows per sublane-vreg; keep block_rows a
    # multiple of the pack factor so the BlockSpec honours the min-tile rule.
    itemsize = jnp.dtype(pred.dtype).itemsize
    sub = max(_SUBLANES, 32 // max(itemsize, 1))
    block_rows = min(_round_up(rows, sub), _round_up(max_block_rows, sub))

    nblocks = _cdiv(rows, block_rows)
    num_p = max(1, min(parallel_splits, nblocks))
    blocks_per_p = _cdiv(nblocks, num_p)
    need_mask = (num_p * blocks_per_p * block_rows) != rows

    kernel = functools.partial(
        _sumsq_kernel, rows=rows, blocks_per_p=blocks_per_p,
        block_rows=block_rows, need_mask=need_mask)

    def in_map(p, r):
        # Clamp so duplicate tail blocks of the parallel split stay in bounds;
        # their contribution is zeroed by the in-kernel row mask.
        return (jnp.minimum(p * blocks_per_p + r, nblocks - 1), 0)

    cost = pl.CostEstimate(
        flops=3 * rows * _LANES,
        transcendentals=0,
        bytes_accessed=2 * rows * _LANES * itemsize
        + num_p * _SUBLANES * _LANES * 4,
    )

    partials = pl.pallas_call(
        kernel,
        out_shape=jax.ShapeDtypeStruct((num_p, _SUBLANES, _LANES), jnp.float32),
        grid_spec=pltpu.PrefetchScalarGridSpec(
            num_scalar_prefetch=0,
            grid=(num_p, blocks_per_p),
            in_specs=[
                pl.BlockSpec((block_rows, _LANES), in_map),
                pl.BlockSpec((block_rows, _LANES), in_map),
            ],
            out_specs=pl.BlockSpec((1, _SUBLANES, _LANES),
                                   lambda p, r: (p, 0, 0)),
        ),
        compiler_params=pltpu.CompilerParams(
            dimension_semantics=("parallel", "arbitrary"),
        ),
        cost_estimate=cost,
    )(pred2d, target2d)

    mse = (jnp.sum(partials) + tail_sumsq) / jnp.float32(n)
    return jnp.sqrt(mse)


if __name__ == "__main__":
    key = jax.random.PRNGKey(0)
    kp, kt = jax.random.split(key)
    shape = (2, 4, 16, 16)
    pred = jax.random.normal(kp, shape, dtype=jnp.float32)
    target = jax.random.normal(kt, shape, dtype=jnp.float32)

    rmse = compute_error(pred, target)
    rmse = jax.block_until_ready(rmse)

    # Pure-JAX reference of the spec's forward pass.
    ref = jnp.sqrt(jnp.mean((target - pred) ** 2))
    assert math.isfinite(float(rmse))
    assert abs(float(rmse) - float(ref)) <= 1e-4 * max(1.0, abs(float(ref))), (
        float(rmse), float(ref))
    print("KERNEL_OK")
</pallas_src>

<mosaic_0001>
module attributes {stable_mosaic.version = 11 : i64} {
  func.func @_sumsq_kernel(%arg0: i32, %arg1: i32, %arg2: memref<16x128xf32, #tpu.memory_space<vmem>>, %arg3: memref<16x128xf32, #tpu.memory_space<vmem>>, %arg4: memref<1x8x128xf32, #tpu.memory_space<vmem>>) attributes {dimension_semantics = [#tpu.dimension_semantics<parallel>, #tpu.dimension_semantics<arbitrary>], iteration_bounds = array<i64: 1, 1>, scalar_prefetch = 0 : i64, scratch_operands = 0 : i64, tpu.core_type = #tpu.core_type<tc>, window_params = [{transform_indices = @transform_0, window_bounds = array<i64: 16, 128>}, {transform_indices = @transform_1, window_bounds = array<i64: 16, 128>}, {transform_indices = @transform_2, window_bounds = array<i64: 1, 8, 128>}]} {
    %c0_i32 = arith.constant 0 : i32
    %0 = arith.cmpi eq, %arg1, %c0_i32 : i32
    %1 = arith.extui %0 : i1 to i32
    %c0_i32_0 = arith.constant 0 : i32
    %2 = arith.cmpi ne, %1, %c0_i32_0 : i32
    scf.if %2 {
      %cst_10 = arith.constant 0.000000e+00 : f32
      %13 = vector.broadcast %cst_10 : f32 to vector<1x8x128xf32>
      %c0_11 = arith.constant 0 : index
      %c0_12 = arith.constant 0 : index
      %c0_13 = arith.constant 0 : index
      %14 = vector.load %arg4[%c0_11, %c0_12, %c0_13] : memref<1x8x128xf32, #tpu.memory_space<vmem>>, vector<1x8x128xf32>
      tpu.vector_store %arg4[%c0_11, %c0_12, %c0_13], %13 {strides = array<i32>} : memref<1x8x128xf32, #tpu.memory_space<vmem>>, vector<1x8x128xf32>,
    } else {
    }
    %c0 = arith.constant 0 : index
    %c0_1 = arith.constant 0 : index
    %3 = vector.load %arg3[%c0, %c0_1] : memref<16x128xf32, #tpu.memory_space<vmem>>, vector<16x128xf32>
    %c0_2 = arith.constant 0 : index
    %c0_3 = arith.constant 0 : index
    %4 = vector.load %arg2[%c0_2, %c0_3] : memref<16x128xf32, #tpu.memory_space<vmem>>, vector<16x128xf32>
    %5 = arith.subf %3, %4 : vector<16x128xf32>
    %6 = arith.mulf %5, %5 : vector<16x128xf32>
    %7 = vector.shape_cast %6 : vector<16x128xf32> to vector<2x8x128xf32>
    %c0_4 = arith.constant 0 : index
    %c0_5 = arith.constant 0 : index
    %c0_6 = arith.constant 0 : index
    %8 = vector.load %arg4[%c0_4, %c0_5, %c0_6] : memref<1x8x128xf32, #tpu.memory_space<vmem>>, vector<1x8x128xf32>
    %cst = arith.constant dense<0.000000e+00> : vector<8x128xf32>
    %9 = vector.multi_reduction <add>, %7, %cst [0] : vector<2x8x128xf32> to vector<8x128xf32>
    %10 = vector.shape_cast %9 : vector<8x128xf32> to vector<1x8x128xf32>
    %11 = arith.addf %8, %10 : vector<1x8x128xf32>
    %c0_7 = arith.constant 0 : index
    %c0_8 = arith.constant 0 : index
    %c0_9 = arith.constant 0 : index
    %12 = vector.load %arg4[%c0_7, %c0_8, %c0_9] : memref<1x8x128xf32, #tpu.memory_space<vmem>>, vector<1x8x128xf32>
    tpu.vector_store %arg4[%c0_7, %c0_8, %c0_9], %11 {strides = array<i32>} : memref<1x8x128xf32, #tpu.memory_space<vmem>>, vector<1x8x128xf32>,
    return
  }
  func.func @transform_0(%arg0: i32, %arg1: i32) -> (i32, i32) {
    %c1_i32 = arith.constant 1 : i32
    %0 = arith.muli %arg0, %c1_i32 : i32
    %1 = arith.addi %0, %arg1 : i32
    %c0_i32 = arith.constant 0 : i32
    %2 = arith.minsi %1, %c0_i32 : i32
    %c0_i32_0 = arith.constant 0 : i32
    %c0_i32_1 = arith.constant 0 : i32
    return %2, %c0_i32_0 : i32, i32
  }
  func.func @transform_1(%arg0: i32, %arg1: i32) -> (i32, i32) {
    %c1_i32 = arith.constant 1 : i32
    %0 = arith.muli %arg0, %c1_i32 : i32
    %1 = arith.addi %0, %arg1 : i32
    %c0_i32 = arith.constant 0 : i32
    %2 = arith.minsi %1, %c0_i32 : i32
    %c0_i32_0 = arith.constant 0 : i32
    %c0_i32_1 = arith.constant 0 : i32
    return %2, %c0_i32_0 : i32, i32
  }
  func.func @transform_2(%arg0: i32, %arg1: i32) -> (i32, i32, i32) {
    %c0_i32 = arith.constant 0 : i32
    %c0_i32_0 = arith.constant 0 : i32
    %c0_i32_1 = arith.constant 0 : i32
    return %arg0, %c0_i32, %c0_i32_0 : i32, i32, i32
  }
}

</mosaic_0001>

<bundles_post_ra>
// kernel: tpu_custom_call.1
= control target key start
LH: loop header
LB: loop body
LE: loop exit
PB: predicated region body
PF: predicated region fallthrough
CT: control target
= control target key end

     0   :  { %7 = vsyncpa [#allocation3], 0  ;;  %s231_s0 = inlined_call_operand.hbm [shape: f32[16,128], index: 0, kind: input, shape index: {}]   ;;  %s232_s1 = inlined_call_operand.hbm [shape: f32[16,128], index: 1, kind: input, shape index: {}]   ;;  %s233_s2 = inlined_call_operand.hbm [shape: f32[1,8,128], index: 2, kind: output, shape index: {}]  }
   0x1   :  { %8 = vsyncpa [#allocation6], 0 }
   0x2   :  { %9 = vsyncpa [#allocation4], 0  ;;  %s175_s9 = smov [#allocation2]   ;;  %s103_s13 = scalar_lea.hbm %s231_s0, 256 }
   0x3   :  { %s21_s10 = sshll.u32 %s175_s9, 4  ;;  %p104_p0 = scmp.ne.s32.totalorder %s231_s0, %s103_s13  ;;  %s22_s10 = int_to_ptr.vmem [resolvable:$true] %s21_s10 }
   0x4   :  { %p107_p1 = scmp.lt.u32.totalorder %s103_s13, %s231_s0 }
   0x6   :  { %p109_p2 = pnand %p107_p1, %p104_p0 }
   0x8   :  { %112 = shalt.err (!%p109_p2)
}
   0x9   :  { %s113_s18 = scalar_lea.vmem %s22_s10, 256  ;;  %p118_p4 = scmp.lt.s32.totalorder %s22_s10, %s22_s10 }
   0xa   :  { %p114_p3 = scmp.ne.s32.totalorder %s22_s10, %s113_s18  ;;  %p119_p5 = scmp.lt.s32.totalorder %s113_s18, %s113_s18 }
   0xc   :  { %p120_p6 = por %p119_p5, %p118_p4 }
   0xe   :  { %p121_p7 = pnand %p120_p6, %p114_p3 }
  0x10   :  { %124 = shalt.err (!%p121_p7)
}
  0x11   :  { %s176_s19 = smov 128   ;;  %s177_s20 = smov 8  }
  0x12   :  { %27 = dma.hbm_to_vmem [thread:$0]  %s231_s0, 256, %s22_s10, [#allocation3], %s176_s19, %s176_s19, %s177_s20  }
  0x13   :  { %s178_s23 = smov [#allocation5]   ;;  %s125_s27 = scalar_lea.hbm %s232_s1, 256 }
  0x14   :  { %s39_s24 = sshll.u32 %s178_s23, 4  ;;  %p126_p8 = scmp.ne.s32.totalorder %s232_s1, %s125_s27  ;;  %s40_s24 = int_to_ptr.vmem [resolvable:$true] %s39_s24 }
  0x15   :  { %p129_p9 = scmp.lt.u32.totalorder %s125_s27, %s232_s1 }
  0x17   :  { %p131_p10 = pnand %p129_p9, %p126_p8 }
  0x19   :  { %134 = shalt.err (!%p131_p10)
}
  0x1a   :  { %s135_s4 = scalar_lea.vmem %s40_s24, 256  ;;  %p140_p12 = scmp.lt.s32.totalorder %s40_s24, %s40_s24 }
  0x1b   :  { %p136_p11 = scmp.ne.s32.totalorder %s40_s24, %s135_s4  ;;  %p141_p13 = scmp.lt.s32.totalorder %s135_s4, %s135_s4 }
  0x1d   :  { %p142_p0 = por %p141_p13, %p140_p12 }
  0x1f   :  { %p143_p1 = pnand %p142_p0, %p136_p11 }
  0x21   :  { %146 = shalt.err (!%p143_p1)
}
  0x22   :  { %45 = dma.hbm_to_vmem [thread:$0]  %s232_s1, 256, %s40_s24, [#allocation6], %s176_s19, %s176_s19, %s177_s20  }
  0x23   :  { %169 = dma.done.wait [#allocation3], 256  }
  0x24   :  { %170 = vsyncadd [#allocation3], 4294967040 }
  0x25   :  { %171 = dma.done.wait [#allocation6], 256  }
  0x26   :  { %172 = vsyncadd [#allocation6], 4294967040  ;;  %v65_v0 = vld [vmem:[#allocation5] sm:$0xff]  ;;  %v66_v1 = vld [vmem:[#allocation5 + $0x8] sm:$0xff]  ;;  %s179_s6 = smov [#allocation7]  }
  0x27   :  { %v67_v2 = vld [vmem:[#allocation2] sm:$0xff]  ;;  %v68_v3 = vld [vmem:[#allocation2 + $0x8] sm:$0xff]  ;;  %s83_s7 = sshll.u32 %s179_s6, 4  ;;  %s84_s7 = int_to_ptr.vmem [resolvable:$true] %s83_s7 }
  0x28   :  { %v69_v4 = vsub.f32 %v65_v0, %v67_v2  ;;  %v70_v5 = vsub.f32 %v66_v1, %v68_v3  ;;  %s147_s8 = scalar_lea.vmem %s84_s7, 128  ;;  %p152_p3 = scmp.lt.s32.totalorder %s84_s7, %s84_s7 }
  0x29   :  { %p148_p2 = scmp.ne.s32.totalorder %s84_s7, %s147_s8  ;;  %p153_p4 = scmp.lt.s32.totalorder %s147_s8, %s147_s8 }
  0x2a   :  { %v71_v6 = vmul.f32 %v69_v4, %v69_v4  ;;  %v72_v7 = vmul.f32 %v70_v5, %v70_v5 }
  0x2b   :  { %p154_p5 = por %p153_p4, %p152_p3 }
  0x2c   :  { %v74_v8 = vadd.f32 %v72_v7, %v71_v6 }
  0x2d   :  { %p155_p6 = pnand %p154_p5, %p148_p2 }
  0x2e   :  { %76 = vst [vmem:[#allocation7] sm:$0xff] %v74_v8 }
  0x2f   :  { %158 = shalt.err (!%p155_p6)
}
  0x30   :  { %s159_s10 = scalar_lea.hbm %s233_s2, 128 }
  0x31   :  { %p160_p7 = scmp.ne.s32.totalorder %s233_s2, %s159_s10  ;;  %p163_p8 = scmp.lt.u32.totalorder %s159_s10, %s233_s2 }
  0x33   :  { %p165_p9 = pnand %p163_p8, %p160_p7 }
  0x35   :  { %168 = shalt.err (!%p165_p9)
}
  0x36   :  { %86 = dma.vmem_to_hbm [thread:$0]  %s84_s7, 128, %s233_s2, [#allocation4]  }
  0x37   :  { %173 = dma.done.wait [#allocation4], 128  }
  0x38   :  { %174 = vsyncadd [#allocation4], 4294967168 }
  0x39   :  { %90 = vsyncpa [#allocation3], 1 }
  0x3a   :  { %91 = vsyncpa [#allocation6], 1 }
  0x3b   :  { %92 = vsyncpa [#allocation4], 1 }

</bundles_post_ra>
